<compile_context>
chip_gen: v7x
topology: tpu7x:2x2x1
jax: 0.10.0
libtpu: 0.0.40
codegen_flags: <defaults>
</compile_context>

<pallas_src>
import functools

import jax
import jax.numpy as jnp
from jax.experimental import pallas as pl
from jax.experimental.pallas import tpu as pltpu


def _biasfree_ln_kernel(x_ref, w_ref, o_ref, *, eps: float):
    """x_ref/o_ref: (C, TSP) tile; w_ref: (C, 1). Normalize over C (axis 0)."""
    x = x_ref[...].astype(jnp.float32)                       # (C, TSP)
    inv_c = jnp.float32(1.0 / x_ref.shape[0])
    # Single pass: var = E[x^2] - mu^2 (clamped), so only (1, TSP) statistics
    # stay live instead of full-tile (x - mu) temporaries.
    s1 = jnp.sum(x, axis=0, keepdims=True)                   # (1, TSP)
    s2 = jnp.sum(x * x, axis=0, keepdims=True)                # (1, TSP)
    mu = s1 * inv_c
    var = jnp.maximum(s2 * inv_c - mu * mu, 0.0)
    inv = jax.lax.rsqrt(var + eps)                            # (1, TSP)
    w = w_ref[...].astype(jnp.float32)                        # (C, 1)
    # BiasFree_LayerNorm: x / sqrt(var + eps) * weight  (NO mean subtraction).
    o_ref[...] = (x * inv * w).astype(o_ref.dtype)


def _vmem_limit_bytes() -> int:
    """Scoped-VMEM request sized from the actual chip (v7x has only 64 MiB)."""
    try:
        cap = int(pltpu.get_tpu_info().vmem_capacity_bytes)
    except Exception:
        cap = 64 * 1024 * 1024  # most conservative (v7x per-core physical VMEM)
    return min((cap * 3) // 4, 64 * 1024 * 1024)


def _choose_spatial_tile(S: int, C: int, in_itemsize: int,
                         vmem_limit: int, num_batches: int) -> int:
    """Largest lane-aligned spatial tile that fits the pipeline in VMEM."""
    # Per spatial element per pipeline step:
    #   2x input buffers + 2x output buffers (input dtype) + ~2 f32 temporaries.
    bytes_per_elem = C * (4 * in_itemsize + 2 * 4)
    budget = vmem_limit // 2            # keep the pipeline well under the limit
    max_tsp = max(128, budget // bytes_per_elem)
    if S <= max_tsp:
        return S                        # whole spatial extent: one lane-dense block
    tsp = (max_tsp // 128) * 128        # lane-aligned; cdiv grid masks the tail
    # Keep >= ~8 grid steps so both TensorCores on dual-core chips stay busy.
    while num_batches * pl.cdiv(S, tsp) < 8 and tsp > 1024:
        tsp = max(1024, ((tsp // 2) // 128) * 128)
    return tsp


def bias_free_layernorm_nchw(x, weight, *, eps: float = 1e-5):
    """Equivalent of Restormer LayerNorm(dim, 'BiasFree').forward for NCHW x."""
    B, C, H, W = x.shape
    S = H * W
    x3 = x.reshape(B, C, S)             # contiguous collapse: no HBM copy
    w2 = weight.reshape(C, 1)

    vmem_limit = _vmem_limit_bytes()
    tsp = _choose_spatial_tile(S, C, x.dtype.itemsize, vmem_limit, B)
    grid = (B, pl.cdiv(S, tsp))

    kernel = functools.partial(_biasfree_ln_kernel, eps=eps)
    out3 = pl.pallas_call(
        kernel,
        out_shape=jax.ShapeDtypeStruct((B, C, S), x.dtype),
        grid=grid,
        in_specs=[
            # batch dim squeezed; C is full-dim (second-minor), spatial on lanes
            pl.BlockSpec((pl.Squeezed(), C, tsp), lambda b, s: (b, 0, s)),
            pl.BlockSpec((C, 1), lambda b, s: (0, 0)),   # weight, no bias operand
        ],
        out_specs=pl.BlockSpec((pl.Squeezed(), C, tsp), lambda b, s: (b, 0, s)),
        compiler_params=pltpu.CompilerParams(
            dimension_semantics=("parallel", "parallel"),
            vmem_limit_bytes=vmem_limit,
        ),
    )(x3, w2)
    return out3.reshape(B, C, H, W)


def _reference(x, weight, eps: float = 1e-5):
    """Pure-JAX reference matching the PyTorch module (to_3d -> LN -> to_4d)."""
    B, C, H, W = x.shape
    xr = jnp.transpose(x, (0, 2, 3, 1)).reshape(B, H * W, C).astype(jnp.float32)
    var = jnp.var(xr, axis=-1, keepdims=True)        # biased (unbiased=False)
    y = xr / jnp.sqrt(var + eps) * weight.astype(jnp.float32)
    y = y.astype(x.dtype)
    return jnp.transpose(y.reshape(B, H, W, C), (0, 3, 1, 2))


if __name__ == "__main__":
    key = jax.random.PRNGKey(0)
    B, C, H, W = 2, 4, 16, 16
    kx, kw = jax.random.split(key)
    x = jax.random.normal(kx, (B, C, H, W), dtype=jnp.float32)

    # Faithful module init (nn.Parameter(torch.ones(dim))), plus a random weight
    # to exercise the per-channel broadcast path.
    weight_ones = jnp.ones((C,), dtype=jnp.float32)
    weight_rand = jax.random.normal(kw, (C,), dtype=jnp.float32)

    fwd = jax.jit(bias_free_layernorm_nchw)

    ok = True
    for weight in (weight_ones, weight_rand):
        out = jax.block_until_ready(fwd(x, weight))
        ref = _reference(x, weight)
        if out.shape != (B, C, H, W):
            ok = False
        if not jnp.allclose(out, ref, atol=1e-5, rtol=1e-5):
            ok = False

    if ok:
        print("KERNEL_OK")
</pallas_src>

<mosaic_0001>
module attributes {stable_mosaic.version = 11 : i64} {
  func.func @_biasfree_ln_kernel(%arg0: i32, %arg1: i32, %arg2: memref<1x4x256xf32, #tpu.memory_space<vmem>>, %arg3: memref<4x1xf32, #tpu.memory_space<vmem>>, %arg4: memref<1x4x256xf32, #tpu.memory_space<vmem>>) attributes {dimension_semantics = [#tpu.dimension_semantics<parallel>, #tpu.dimension_semantics<parallel>], iteration_bounds = array<i64: 2, 1>, scalar_prefetch = 0 : i64, scratch_operands = 0 : i64, tpu.core_type = #tpu.core_type<tc>, window_params = [{transform_indices = @transform_0, window_bounds = array<i64: 1, 4, 256>}, {pipeline_mode = #tpu.pipeline_mode<synchronous>, transform_indices = @transform_1, window_bounds = array<i64: 4, 1>}, {transform_indices = @transform_2, window_bounds = array<i64: 1, 4, 256>}]} {
    %c0 = arith.constant 0 : index
    %c0_0 = arith.constant 0 : index
    %c0_1 = arith.constant 0 : index
    %0 = vector.load %arg2[%c0, %c0_0, %c0_1] : memref<1x4x256xf32, #tpu.memory_space<vmem>>, vector<1x4x256xf32>
    %1 = vector.shape_cast %0 : vector<1x4x256xf32> to vector<4x256xf32>
    %cst = arith.constant dense<0.000000e+00> : vector<256xf32>
    %2 = vector.multi_reduction <add>, %1, %cst [0] : vector<4x256xf32> to vector<256xf32>
    %3 = vector.shape_cast %2 : vector<256xf32> to vector<1x256xf32>
    %4 = arith.mulf %1, %1 : vector<4x256xf32>
    %cst_2 = arith.constant dense<0.000000e+00> : vector<256xf32>
    %5 = vector.multi_reduction <add>, %4, %cst_2 [0] : vector<4x256xf32> to vector<256xf32>
    %6 = vector.shape_cast %5 : vector<256xf32> to vector<1x256xf32>
    %cst_3 = arith.constant 2.500000e-01 : f32
    %7 = vector.broadcast %cst_3 : f32 to vector<1x256xf32>
    %8 = arith.mulf %3, %7 : vector<1x256xf32>
    %cst_4 = arith.constant 2.500000e-01 : f32
    %9 = vector.broadcast %cst_4 : f32 to vector<1x256xf32>
    %10 = arith.mulf %6, %9 : vector<1x256xf32>
    %11 = arith.mulf %8, %8 : vector<1x256xf32>
    %12 = arith.subf %10, %11 : vector<1x256xf32>
    %cst_5 = arith.constant 0.000000e+00 : f32
    %13 = vector.broadcast %cst_5 : f32 to vector<1x256xf32>
    %14 = arith.maximumf %12, %13 : vector<1x256xf32>
    %cst_6 = arith.constant 9.99999974E-6 : f32
    %15 = vector.broadcast %cst_6 : f32 to vector<1x256xf32>
    %16 = arith.addf %14, %15 : vector<1x256xf32>
    %17 = math.rsqrt %16 : vector<1x256xf32>
    %c0_7 = arith.constant 0 : index
    %c0_8 = arith.constant 0 : index
    %18 = vector.load %arg3[%c0_7, %c0_8] : memref<4x1xf32, #tpu.memory_space<vmem>>, vector<4x1xf32>
    %19 = vector.broadcast %17 : vector<1x256xf32> to vector<4x256xf32>
    %20 = arith.mulf %1, %19 : vector<4x256xf32>
    %21 = vector.broadcast %18 : vector<4x1xf32> to vector<4x256xf32>
    %22 = arith.mulf %20, %21 : vector<4x256xf32>
    %c0_9 = arith.constant 0 : index
    %c0_10 = arith.constant 0 : index
    %c0_11 = arith.constant 0 : index
    %23 = vector.load %arg4[%c0_9, %c0_10, %c0_11] : memref<1x4x256xf32, #tpu.memory_space<vmem>>, vector<1x4x256xf32>
    %24 = vector.shape_cast %23 : vector<1x4x256xf32> to vector<4x256xf32>
    %25 = vector.shape_cast %22 : vector<4x256xf32> to vector<1x4x256xf32>
    tpu.vector_store %arg4[%c0_9, %c0_10, %c0_11], %25 {strides = array<i32>} : memref<1x4x256xf32, #tpu.memory_space<vmem>>, vector<1x4x256xf32>,
    return
  }
  func.func @transform_0(%arg0: i32, %arg1: i32) -> (i32, i32, i32) {
    %c0_i32 = arith.constant 0 : i32
    %c0_i32_0 = arith.constant 0 : i32
    return %arg0, %c0_i32, %arg1 : i32, i32, i32
  }
  func.func @transform_1(%arg0: i32, %arg1: i32) -> (i32, i32) {
    %c0_i32 = arith.constant 0 : i32
    %c0_i32_0 = arith.constant 0 : i32
    %c0_i32_1 = arith.constant 0 : i32
    return %c0_i32, %c0_i32_0 : i32, i32
  }
  func.func @transform_2(%arg0: i32, %arg1: i32) -> (i32, i32, i32) {
    %c0_i32 = arith.constant 0 : i32
    %c0_i32_0 = arith.constant 0 : i32
    return %arg0, %c0_i32, %arg1 : i32, i32, i32
  }
}

</mosaic_0001>

<bundles_post_ra>
// kernel: bias_free_layernorm_nchw.1
= control target key start
LH: loop header
LB: loop body
LE: loop exit
PB: predicated region body
PF: predicated region fallthrough
CT: control target
= control target key end

     0   :  { %s427_s9 = smov 0   ;;  %s429_s10 = smov 0   ;;  %s470_s0 = inlined_call_operand.vmem [shape: f32[2,4,256], index: 0, kind: input, shape index: {}]   ;;  %s471_s1 = inlined_call_operand.vmem [shape: f32[4,1], index: 1, kind: input, shape index: {}]   ;;  %s472_s2 = inlined_call_operand.vmem [shape: f32[2,4,256], index: 2, kind: output, shape index: {}]  }
   0x1   :  { %s431_s11 = smov 0  }
   0x2 LB: > { %s24_s12 = sadd.s32 1, %s404_s10  ;;  %p345_p0 = scmp.ge.s32.totalorder %s408_s11, 1  ;;  %s408_s11 = sphi %s431_s11, %s12_s11   ;;  %s404_s10 = sphi %s429_s10, %s474_s10   ;;  %s400_s9 = sphi %s427_s9, %s473_s9  }
   0x3   : > { %p26_p1 = scmp.ge.s32.totalorder %s24_s12, 2  ;;  %p133_p2 = scmp.lt.s32.totalorder %s408_s11, 3 }
   0x5   : > { %s476_s12 = smov (%p26_p1, %s24_s12), 0  ;;  %p134_p3 = pnand %p345_p0, %p133_p2 }
   0x6   : > { %v234_v0 = vld [vmem:[%s471_s1] sm:$0xf] (!%p134_p3)  ;;  %v410_v1 = vmov (!%p134_p3), 0   ;;  %p164_p4 = scmp.lt.s32.totalorder (!%p134_p3), %s400_s9, 1  ;;  %vm187_vm0 = vcmask (!%p134_p3), 1043456   ;;  %v247_v48 = vlaneseq (!%p134_p3) }
   0x7   : > { %137 = sbr.rel (%p134_p3) target bundleno = 141 (0x8d), region = 28  ;;  %380 = vset.pattern.permute.xlu0 (!%p134_p3), %v410_v1  ;;  %v411_v46 = vmov (!%p134_p3), 839922192  }
   0x8   : > { %242 = vperm.xlu0 (!%p134_p3), %380, %v234_v0   ;;  %v245_v47 = vunpack.c.l.s4 (!%p134_p3), %v411_v46  ;;  %v248_v52 = vshrl.u32 (!%p134_p3), %v247_v48, 7 }
   0xa   : > { %v246_v51 = vunpack.c.0.s8 (!%p134_p3), %v245_v47 }
   0xc   : > { %v249_v54 = vsub.s32 (!%p134_p3), %v246_v51, %v248_v52 }
   0xe   : > { %s478_s9 = smov (!%p164_p4, %s400_s9), 1 }
   0xf   : > { %s352_s15 = sshll.u32 %s478_s9, 3 }
  0x10   : > { %s171_s18 = scalar_lea.vmem %s470_s0, %s352_s15  ;;  %s181_s21 = scalar_lea.vmem %s472_s2, %s352_s15 }
  0x11   : > { %v183_v2 = vld [vmem:[%s171_s18] sm:$0xff] }
  0x12   : > { %v185_v3 = vcombine.high %v183_v2, %v183_v2  ;;  %v202_v4 = vmul.f32 %v183_v2, %v183_v2  ;;  %v188_v5 = vsel %vm187_vm0, %v183_v2, 0.0 }
  0x13   : > { %v189_v8 = vrot.slane %v188_v5, 4 }
  0x14   : > { %v195_v6 = vsel %vm187_vm0, %v185_v3, 0.0  ;;  %v204_v7 = vcombine.high %v202_v4, %v202_v4  ;;  %v206_v10 = vsel %vm187_vm0, %v202_v4, 0.0 }
  0x15   : > { %v196_v9 = vrot.slane %v195_v6, 4  ;;  %v190_v12 = vadd.f32 %v189_v8, %v188_v5  ;;  %v207_v13 = vrot.slane %v206_v10, 4 }
  0x16   : > { %v213_v11 = vsel %vm187_vm0, %v204_v7, 0.0 }
  0x17   : > { %v197_v14 = vadd.f32 %v196_v9, %v195_v6  ;;  %v214_v15 = vrot.slane %v213_v11, 4  ;;  %v191_v16 = vrot.slane %v190_v12, 2  ;;  %v208_v17 = vadd.f32 %v207_v13, %v206_v10 }
  0x19   : > { %v198_v18 = vrot.slane %v197_v14, 2  ;;  %v215_v19 = vadd.f32 %v214_v15, %v213_v11  ;;  %v192_v20 = vadd.f32 %v191_v16, %v190_v12  ;;  %v209_v21 = vrot.slane %v208_v17, 2 }
  0x1b   : > { %v199_v22 = vadd.f32 %v198_v18, %v197_v14  ;;  %v216_v23 = vrot.slane %v215_v19, 2  ;;  %v193_v24 = vrot.slane %v192_v20, 1  ;;  %v210_v25 = vadd.f32 %v209_v21, %v208_v17 }
  0x1d   : > { %v200_v26 = vrot.slane %v199_v22, 1  ;;  %v217_v27 = vadd.f32 %v216_v23, %v215_v19  ;;  %v194_v28 = vadd.f32 %v193_v24, %v192_v20  ;;  %v211_v29 = vrot.slane %v210_v25, 1 }
  0x1f   : > { %v201_v30 = vadd.f32 %v200_v26, %v199_v22  ;;  %v218_v31 = vrot.slane %v217_v27, 1  ;;  %v212_v32 = vadd.f32 %v211_v29, %v210_v25  ;;  %v220_v33 = vmul.f32 0.25, %v194_v28 }
  0x21   : > { %v219_v34 = vadd.f32 %v218_v31, %v217_v27  ;;  %v221_v35 = vmul.f32 0.25, %v201_v30  ;;  %v222_v36 = vmul.f32 0.25, %v212_v32  ;;  %v224_v37 = vmul.f32 %v220_v33, %v220_v33 }
  0x23   : > { %v223_v38 = vmul.f32 0.25, %v219_v34  ;;  %v225_v39 = vmul.f32 %v221_v35, %v221_v35  ;;  %v226_v40 = vsub.f32 %v222_v36, %v224_v37 }
  0x25   : > { %v227_v41 = vsub.f32 %v223_v38, %v225_v39  ;;  %v228_v42 = vmax.f32 %v226_v40, 0.0 }
  0x27   : > { %v229_v43 = vmax.f32 %v227_v41, 0.0  ;;  %v230_v44 = vadd.f32 1e-05, %v228_v42 }
  0x29   : > { %v231_v45 = vadd.f32 1e-05, %v229_v43  ;;  %382 = vrsqrt.f32 %v230_v44 }
  0x2b   : > { %384 = vrsqrt.f32 %v231_v45 }
  0x33   : > { %v383_v49 = vpop.eup %382 }
  0x35   : > { %v385_v50 = vpop.eup %384 }
  0x36   : > { %v237_v53 = vcombine.low %v383_v49, %v385_v50 }
  0x38   : > { %v239_v55 = vmul.f32 %v237_v53, %v183_v2 }
  0x87   : > { %v243_v56 = vpop.permute.xlu0 %242 }
  0x88   : > { %v250_v57 = vrot.slane %v243_v56, %v249_v54 }
  0x8a   : > { %v252_v58 = vmul.f32 %v250_v57, %v239_v55 }
  0x8c   : > { %253 = vst [vmem:[%s181_s21] sm:$0xff] %v252_v58 }
  0x8d PF: > { %s12_s11 = sadd.s32 1, %s408_s11   ;;  %s473_s9 = smov %s404_s10 }
  0x8e   : > { %p9_p5 = scmp.ge.s32.totalorder %s12_s11, 4   ;;  %s474_s10 = smov %s476_s12 }
  0x90   :  { %11 = sbr.rel (!%p9_p5) target bundleno = 2 (0x2), region = 58 }

</bundles_post_ra>
